<compile_context>
chip_gen: v7x
topology: tpu7x:2x2x1
jax: 0.10.0
libtpu: 0.0.40
codegen_flags: <defaults>
</compile_context>

<pallas_src>
import math
import functools

import numpy as np
import jax
import jax.numpy as jnp
from jax.experimental import pallas as pl
from jax.experimental.pallas import tpu as pltpu


# ----------------------------- helpers ------------------------------------- #

def is_power_of_2(n: int) -> bool:
    return n > 0 and (n & (n - 1)) == 0


def next_power_of_2(n: int) -> int:
    if n <= 1:
        return 1
    return 2 ** ((n - 1).bit_length())


def _round_up(n: int, m: int) -> int:
    return ((n + m - 1) // m) * m


def create_hadamard_matrix_np(size: int) -> np.ndarray:
    """Sylvester Hadamard matrix (float32). Non-power-of-2 sizes are truncated
    from the next power of 2 (matches the PyTorch fallback path)."""
    n = next_power_of_2(size)
    H = np.array([[1.0]], dtype=np.float32)
    while H.shape[0] < n:
        H = np.block([[H, H], [H, -H]])
    return np.ascontiguousarray(H[:size, :size])


def _device_budget():
    """(vmem_cap_bytes, num_tensorcores) for the local TPU generation."""
    kind = ""
    try:
        kind = jax.devices()[0].device_kind.lower()
    except Exception:
        pass
    if ("v5" in kind) or ("v6" in kind):
        cap, cores = 100 * 1024 * 1024, 1      # 128 MiB physical, single TC
    elif "7" in kind:
        cap, cores = 56 * 1024 * 1024, 2       # 64 MiB/TC physical, 2 TCs
    else:
        cap, cores = 56 * 1024 * 1024, 1       # unknown: conservative
    try:  # refine against the reported physical VMEM if the query is available
        phys = int(pltpu.get_tpu_info().vmem_capacity_bytes)
        cap = min(cap, max(phys - 8 * 1024 * 1024, 16 * 1024 * 1024))
    except Exception:
        pass
    return cap, cores


# ------------------------------ kernels ------------------------------------ #

def _hadamard_affine_kernel(x_ref, h_ref, scale_ref, shift_ref, o_ref):
    # x_ref: (tm, lane); h_ref: (lane, tn); scale/shift: (1, tn); o_ref: (tm, tn)
    # 1/sqrt(size) is pre-folded into scale_ref (f32), so no extra VPU multiply.
    y = jnp.dot(x_ref[...], h_ref[...], preferred_element_type=jnp.float32)
    o_ref[...] = (scale_ref[...] * y + shift_ref[...]).astype(o_ref.dtype)


def _hadamard_kernel(x_ref, h_ref, o_ref, *, inv_norm):
    y = jnp.dot(x_ref[...], h_ref[...], preferred_element_type=jnp.float32)
    if inv_norm != 1.0:
        y = y * inv_norm
    o_ref[...] = y.astype(o_ref.dtype)


# ------------------------------ wrapper ------------------------------------ #

def adaptive_hadamard_transform_pallas(x, scale=None, shift=None, *,
                                       normalize=True, tm=1024):
    """out = scale * hadamard(x, normalize) + shift, transform along last axis.

    x:     (..., size)
    scale: (size,) or None (treated as ones;  epilogue skipped if both None)
    shift: (size,) or None (treated as zeros; epilogue skipped if both None)
    """
    *batch_dims, size = x.shape
    Hnp = create_hadamard_matrix_np(size)          # (size, size) f32, exact +/-1

    x_flat = x.reshape(-1, size)
    rows = x_flat.shape[0]

    # --- lane packing for small transform sizes: block-diagonal H ----------- #
    pack = 1
    rows_padded = rows
    if size < 128 and (128 % size == 0) and rows > 0:
        pack = 128 // size
        rows_padded = _round_up(rows, pack)
        if rows_padded != rows:
            x_flat = jnp.pad(x_flat, ((0, rows_padded - rows), (0, 0)))
        Hnp = np.kron(np.eye(pack, dtype=np.float32), Hnp)   # (128, 128)
        x_flat = x_flat.reshape(rows_padded // pack, size * pack)

    rows_p, lane = x_flat.shape
    H = jnp.asarray(Hnp).astype(x.dtype)           # bf16 H is exact (+/-1)

    inv_norm = float(1.0 / math.sqrt(size)) if normalize else 1.0

    apply_affine = (scale is not None) or (shift is not None)
    if apply_affine:
        if scale is None:
            scale = jnp.ones((size,), dtype=jnp.float32)
        if shift is None:
            shift = jnp.zeros((size,), dtype=jnp.float32)
        # Fold the normalization into the f32 scale (exact wrt the f32 math).
        scale_op = jnp.tile(scale.astype(jnp.float32).reshape(1, size) * inv_norm,
                            (1, pack))
        shift_op = jnp.tile(shift.astype(jnp.float32).reshape(1, size), (1, pack))

    # --- per-generation budget & tile sizing --------------------------------- #
    itemsize = jnp.dtype(x.dtype).itemsize
    vmem_cap, n_cores = _device_budget()
    headroom = 4 * 1024 * 1024

    tn_eff = lane                                   # keep H fully resident if possible
    if rows_p <= 8:
        tm_eff = max(rows_p, 1)                     # block == full dim (layout-legal)
    else:
        tm_floor8 = (rows_p // 8) * 8               # largest multiple of 8 <= rows_p
        tm_eff = max(8, min(_round_up(tm, 8), tm_floor8))
        if n_cores > 1:
            # Ensure >= n_cores row tiles so both TensorCores get work on v7x.
            tm_balanced = max(8, _round_up(pl.cdiv(rows_p, n_cores), 8))
            tm_eff = min(tm_eff, tm_balanced)

    def _est(tm_e, tn_e):
        return (2 * tm_e * lane * itemsize          # x tiles (double-buffered)
                + 2 * lane * tn_e * itemsize        # H tiles
                + 2 * tm_e * tn_e * itemsize        # out tiles
                + 4 * 2 * tn_e * 4)                 # scale/shift tiles

    # Budget guard: shrink row tile first, then column-tile H, then rows again.
    while _est(tm_eff, tn_eff) + headroom > vmem_cap and tm_eff > 256:
        tm_eff = max(256, _round_up(tm_eff // 2, 8))
    while _est(tm_eff, tn_eff) + headroom > vmem_cap and tn_eff > 128:
        tn_eff = max(128, _round_up(tn_eff // 2, 128))
    while _est(tm_eff, tn_eff) + headroom > vmem_cap and tm_eff > 8:
        tm_eff = max(8, _round_up(tm_eff // 2, 8))

    grid = (pl.cdiv(rows_p, tm_eff), pl.cdiv(lane, tn_eff))
    vmem_limit = int(min(vmem_cap, _est(tm_eff, tn_eff) + headroom))

    in_specs = [
        pl.BlockSpec((tm_eff, lane), lambda i, j: (i, 0)),     # x row tile
        pl.BlockSpec((lane, tn_eff), lambda i, j: (0, j)),     # H (resident if J==1)
    ]
    args = [x_flat, H]
    if apply_affine:
        in_specs += [
            pl.BlockSpec((1, tn_eff), lambda i, j: (0, j)),    # scale (norm folded)
            pl.BlockSpec((1, tn_eff), lambda i, j: (0, j)),    # shift
        ]
        args += [scale_op, shift_op]
        kernel = _hadamard_affine_kernel
    else:
        kernel = functools.partial(_hadamard_kernel, inv_norm=inv_norm)

    out = pl.pallas_call(
        kernel,
        out_shape=jax.ShapeDtypeStruct((rows_p, lane), x.dtype),
        grid_spec=pltpu.PrefetchScalarGridSpec(
            num_scalar_prefetch=0,
            grid=grid,
            in_specs=in_specs,
            out_specs=pl.BlockSpec((tm_eff, tn_eff), lambda i, j: (i, j)),
        ),
        compiler_params=pltpu.CompilerParams(
            # both axes are independent (no accumulation) -> either can be
            # sharded across the 2 TensorCores on v7x
            dimension_semantics=("parallel", "parallel"),
            vmem_limit_bytes=vmem_limit,
        ),
    )(*args)

    if pack > 1:
        out = out.reshape(rows_padded, size)
        if rows_padded != rows:
            out = out[:rows]
    return out.reshape(*batch_dims, size)


# ------------------------------ reference ---------------------------------- #

def hadamard_transform_ref(x, scale, shift, normalize=True):
    """Pure-JAX reference (matches the PyTorch module's forward)."""
    *batch_dims, size = x.shape
    H = jnp.asarray(create_hadamard_matrix_np(size), dtype=jnp.float32)
    y = x.reshape(-1, size).astype(jnp.float32) @ H.T
    if normalize:
        y = y / math.sqrt(size)
    y = y.reshape(*batch_dims, size)
    return (scale * y + shift).astype(x.dtype)


# -------------------------------- main -------------------------------------- #

if __name__ == "__main__":
    key = jax.random.PRNGKey(0)
    k1, k2, k3, k4, k5 = jax.random.split(key, 5)

    # Case 1: small transform size -> lane-packed path (pack=4, block-diag H128).
    # Parameters at module defaults (init_scale=1.0, init_shift=0.0).
    batch, seq, size = 2, 8, 32
    x = jax.random.normal(k1, (batch, seq, size), dtype=jnp.float32)
    scale = jnp.ones((size,), dtype=jnp.float32)
    shift = jnp.zeros((size,), dtype=jnp.float32)

    out = adaptive_hadamard_transform_pallas(x, scale, shift, normalize=True)
    out = jax.block_until_ready(out)
    ref = hadamard_transform_ref(x, scale, shift, normalize=True)
    assert out.shape == x.shape
    assert jnp.allclose(out, ref, atol=1e-3, rtol=1e-3), "mismatch vs reference (size=32)"

    # Case 2: size=128 (no packing), non-trivial learned scale/shift.
    size2 = 128
    x2 = jax.random.normal(k2, (batch, seq, size2), dtype=jnp.float32)
    scale2 = 1.0 + 0.1 * jax.random.normal(k3, (size2,), dtype=jnp.float32)
    shift2 = 0.1 * jax.random.normal(k4, (size2,), dtype=jnp.float32)

    out2 = adaptive_hadamard_transform_pallas(x2, scale2, shift2, normalize=True)
    out2 = jax.block_until_ready(out2)
    ref2 = hadamard_transform_ref(x2, scale2, shift2, normalize=True)
    assert jnp.allclose(out2, ref2, atol=1e-3, rtol=1e-3), "mismatch vs reference (size=128)"

    # Case 3: size=16 with a row count NOT divisible by the lane-pack factor
    # (exercises the zero-pad + slice path; previously fell back to masked stores).
    size3 = 16
    x3 = jax.random.normal(k5, (3, 5, size3), dtype=jnp.float32)
    scale3 = jnp.full((size3,), 1.0, dtype=jnp.float32)
    shift3 = jnp.full((size3,), 0.0, dtype=jnp.float32)

    out3 = adaptive_hadamard_transform_pallas(x3, scale3, shift3, normalize=True)
    out3 = jax.block_until_ready(out3)
    ref3 = hadamard_transform_ref(x3, scale3, shift3, normalize=True)
    assert out3.shape == x3.shape
    assert jnp.allclose(out3, ref3, atol=1e-3, rtol=1e-3), "mismatch vs reference (size=16)"

    print("KERNEL_OK")
</pallas_src>

<mosaic_0001>
module attributes {stable_mosaic.version = 11 : i64} {
  func.func @_hadamard_affine_kernel(%arg0: i32, %arg1: i32, %arg2: memref<4x128xf32, #tpu.memory_space<vmem>>, %arg3: memref<128x128xf32, #tpu.memory_space<vmem>>, %arg4: memref<1x128xf32, #tpu.memory_space<vmem>>, %arg5: memref<1x128xf32, #tpu.memory_space<vmem>>, %arg6: memref<4x128xf32, #tpu.memory_space<vmem>>) attributes {dimension_semantics = [#tpu.dimension_semantics<parallel>, #tpu.dimension_semantics<parallel>], iteration_bounds = array<i64: 1, 1>, scalar_prefetch = 0 : i64, scratch_operands = 0 : i64, tpu.core_type = #tpu.core_type<tc>, window_params = [{transform_indices = @transform_0, window_bounds = array<i64: 4, 128>}, {transform_indices = @transform_1, window_bounds = array<i64: 128, 128>}, {transform_indices = @transform_2, window_bounds = array<i64: 1, 128>}, {transform_indices = @transform_3, window_bounds = array<i64: 1, 128>}, {transform_indices = @transform_4, window_bounds = array<i64: 4, 128>}]} {
    %c0 = arith.constant 0 : index
    %c0_0 = arith.constant 0 : index
    %0 = vector.load %arg2[%c0, %c0_0] : memref<4x128xf32, #tpu.memory_space<vmem>>, vector<4x128xf32>
    %c0_1 = arith.constant 0 : index
    %c0_2 = arith.constant 0 : index
    %1 = vector.load %arg3[%c0_1, %c0_2] : memref<128x128xf32, #tpu.memory_space<vmem>>, vector<128x128xf32>
    %cst = arith.constant dense<0.000000e+00> : vector<4x128xf32>
    %2 = tpu.matmul %0, %1, %cst {dimension_numbers = #tpu.dot_dimension_numbers<[1], [0], [0], [1], [0, 0, 1, 1], [], []>} : vector<4x128xf32>, vector<128x128xf32>, vector<4x128xf32> -> vector<4x128xf32>
    %c0_3 = arith.constant 0 : index
    %c0_4 = arith.constant 0 : index
    %3 = vector.load %arg4[%c0_3, %c0_4] : memref<1x128xf32, #tpu.memory_space<vmem>>, vector<1x128xf32>
    %4 = vector.broadcast %3 : vector<1x128xf32> to vector<4x128xf32>
    %5 = arith.mulf %4, %2 : vector<4x128xf32>
    %c0_5 = arith.constant 0 : index
    %c0_6 = arith.constant 0 : index
    %6 = vector.load %arg5[%c0_5, %c0_6] : memref<1x128xf32, #tpu.memory_space<vmem>>, vector<1x128xf32>
    %7 = vector.broadcast %6 : vector<1x128xf32> to vector<4x128xf32>
    %8 = arith.addf %5, %7 : vector<4x128xf32>
    %c0_7 = arith.constant 0 : index
    %c0_8 = arith.constant 0 : index
    %9 = vector.load %arg6[%c0_7, %c0_8] : memref<4x128xf32, #tpu.memory_space<vmem>>, vector<4x128xf32>
    tpu.vector_store %arg6[%c0_7, %c0_8], %8 {strides = array<i32>} : memref<4x128xf32, #tpu.memory_space<vmem>>, vector<4x128xf32>,
    return
  }
  func.func @transform_0(%arg0: i32, %arg1: i32) -> (i32, i32) {
    %c0_i32 = arith.constant 0 : i32
    %c0_i32_0 = arith.constant 0 : i32
    return %arg0, %c0_i32 : i32, i32
  }
  func.func @transform_1(%arg0: i32, %arg1: i32) -> (i32, i32) {
    %c0_i32 = arith.constant 0 : i32
    %c0_i32_0 = arith.constant 0 : i32
    return %c0_i32, %arg1 : i32, i32
  }
  func.func @transform_2(%arg0: i32, %arg1: i32) -> (i32, i32) {
    %c0_i32 = arith.constant 0 : i32
    %c0_i32_0 = arith.constant 0 : i32
    return %c0_i32, %arg1 : i32, i32
  }
  func.func @transform_3(%arg0: i32, %arg1: i32) -> (i32, i32) {
    %c0_i32 = arith.constant 0 : i32
    %c0_i32_0 = arith.constant 0 : i32
    return %c0_i32, %arg1 : i32, i32
  }
  func.func @transform_4(%arg0: i32, %arg1: i32) -> (i32, i32) {
    %c0_i32 = arith.constant 0 : i32
    return %arg0, %arg1 : i32, i32
  }
}

</mosaic_0001>

<bundles_post_ra>
// kernel: tpu_custom_call.1
= control target key start
LH: loop header
LB: loop body
LE: loop exit
PB: predicated region body
PF: predicated region fallthrough
CT: control target
= control target key end

     0   :  { %9 = vsyncpa [#allocation3], 0  ;;  %s404_s0 = inlined_call_operand.hbm [shape: f32[4,128], index: 0, kind: input, shape index: {}]   ;;  %s405_s1 = inlined_call_operand.hbm [shape: f32[128,128], index: 1, kind: input, shape index: {}]   ;;  %s406_s2 = inlined_call_operand.vmem [shape: f32[1,128], index: 2, kind: input, shape index: {}]   ;;  %s407_s3 = inlined_call_operand.vmem [shape: f32[1,128], index: 3, kind: input, shape index: {}]   ;;  %s408_s4 = inlined_call_operand.hbm [shape: f32[4,128], index: 4, kind: output, shape index: {}]  }
   0x1   :  { %10 = vsyncpa [#allocation6], 0 }
   0x2   :  { %11 = vsyncpa [#allocation4], 0  ;;  %s322_s15 = smov [#allocation2]   ;;  %s323_s17 = smov [#allocation5]  }
   0x3   :  { %s18_s16 = sshll.u32 %s322_s15, 4  ;;  %s27_s18 = sshll.u32 %s323_s17, 4  ;;  %s19_s16 = int_to_ptr.vmem [resolvable:$true] %s18_s16  ;;  %s355_s18 = int_to_ptr.vmem [resolvable:$true] %s27_s18 }
   0x4   :  { %s250_s21 = scalar_lea.hbm %s404_s0, 64 }
   0x5   :  { %p251_p0 = scmp.ne.s32.totalorder %s404_s0, %s250_s21  ;;  %p254_p1 = scmp.lt.u32.totalorder %s250_s21, %s404_s0 }
   0x7   :  { %p256_p2 = pnand %p254_p1, %p251_p0 }
   0x9   :  { %259 = shalt.err (!%p256_p2)
}
   0xa   :  { %s260_s26 = scalar_lea.vmem %s19_s16, 64  ;;  %p265_p4 = scmp.lt.s32.totalorder %s19_s16, %s19_s16 }
   0xb   :  { %p261_p3 = scmp.ne.s32.totalorder %s19_s16, %s260_s26  ;;  %p266_p5 = scmp.lt.s32.totalorder %s260_s26, %s260_s26 }
   0xd   :  { %p267_p6 = por %p266_p5, %p265_p4 }
   0xf   :  { %p268_p7 = pnand %p267_p6, %p261_p3 }
  0x11   :  { %271 = shalt.err (!%p268_p7)
}
  0x12   :  { %21 = dma.hbm_to_vmem [thread:$0]  %s404_s0, 64, %s19_s16, [#allocation3]  }
  0x13   :  { %s272_s5 = scalar_lea.hbm %s405_s1, 2048 }
  0x14   :  { %p273_p8 = scmp.ne.s32.totalorder %s405_s1, %s272_s5  ;;  %p276_p9 = scmp.lt.u32.totalorder %s272_s5, %s405_s1 }
  0x16   :  { %p278_p10 = pnand %p276_p9, %p273_p8 }
  0x18   :  { %281 = shalt.err (!%p278_p10)
}
  0x19   :  { %s282_s10 = scalar_lea.vmem %s355_s18, 2048  ;;  %p287_p12 = scmp.lt.s32.totalorder %s355_s18, %s355_s18 }
  0x1a   :  { %p283_p11 = scmp.ne.s32.totalorder %s355_s18, %s282_s10  ;;  %p288_p13 = scmp.lt.s32.totalorder %s282_s10, %s282_s10 }
  0x1c   :  { %p289_p0 = por %p288_p13, %p287_p12 }
  0x1e   :  { %p290_p1 = pnand %p289_p0, %p283_p11 }
  0x20   :  { %293 = shalt.err (!%p290_p1)
}
  0x21   :  { %s324_s0 = smov 128   ;;  %s325_s11 = smov 8  }
  0x22   :  { %33 = dma.hbm_to_vmem [thread:$0]  %s405_s1, 2048, %s355_s18, [#allocation6], %s324_s0, %s324_s0, %s325_s11  }
  0x23   :  { %316 = dma.done.wait [#allocation3], 64  }
  0x24   :  { %317 = vsyncadd [#allocation3], 4294967232 }
  0x25   :  { %318 = dma.done.wait [#allocation6], 2048  }
  0x26   :  { %319 = vsyncadd [#allocation6], 4294965248  ;;  %v326_v0 = vmov 0.0|0.0   ;;  %vm327_vm0 = vmmov 0   ;;  %v328_v1 = vmov 0.0   ;;  %v45_v2 = vld [vmem:[#allocation5] sm:$0xff] }
  0x27   :  { %218 = vmatprep.subr.bf16.mxu0 %v326_v0  ;;  %215 = vmatprep.mubr.msk.f32.mxu0 %vm327_vm0, %v328_v1  ;;  %v46_v3 = vld [vmem:[#allocation5 + $0x8] sm:$0xff]  ;;  %v47_v4 = vld [vmem:[#allocation5 + $0x10] sm:$0xff]  ;;  %v48_v6 = vld [vmem:[#allocation5 + $0x18] sm:$0xff]  ;;  %s329_s17 = smov [#allocation7]  }
  0x28   :  { %v219_v5 = vpack.c.bf16 %v46_v3, %v45_v2  ;;  %v222_v7 = vpack.c.bf16 %v48_v6, %v47_v4  ;;  %v49_v8 = vld [vmem:[#allocation5 + $0x20] sm:$0xff]  ;;  %v50_v9 = vld [vmem:[#allocation5 + $0x28] sm:$0xff]  ;;  %v51_v11 = vld [vmem:[#allocation5 + $0x30] sm:$0xff]  ;;  %s154_s18 = sshll.u32 %s329_s17, 4  ;;  %s155_s18 = int_to_ptr.vmem [resolvable:$true] %s154_s18 }
  0x29   :  { %v225_v10 = vpack.c.bf16 %v50_v9, %v49_v8  ;;  %v52_v12 = vld [vmem:[#allocation5 + $0x38] sm:$0xff]  ;;  %v53_v14 = vld [vmem:[#allocation5 + $0x40] sm:$0xff]  ;;  %v54_v15 = vld [vmem:[#allocation5 + $0x48] sm:$0xff]  ;;  %s294_s19 = scalar_lea.vmem %s155_s18, 64  ;;  %p299_p3 = scmp.lt.s32.totalorder %s155_s18, %s155_s18 }
  0x2a   :  { %220 = vmatpush3.bf16.msra.mxu0 %v219_v5  ;;  %v228_v13 = vpack.c.bf16 %v52_v12, %v51_v11  ;;  %v231_v16 = vpack.c.bf16 %v54_v15, %v53_v14  ;;  %v55_v17 = vld [vmem:[#allocation5 + $0x50] sm:$0xff]  ;;  %v56_v18 = vld [vmem:[#allocation5 + $0x58] sm:$0xff]  ;;  %v57_v20 = vld [vmem:[#allocation5 + $0x60] sm:$0xff]  ;;  %p295_p2 = scmp.ne.s32.totalorder %s155_s18, %s294_s19  ;;  %p300_p4 = scmp.lt.s32.totalorder %s294_s19, %s294_s19 }
  0x2b   :  { %221 = vmatprep.subr.bf16.mxu0 %v326_v0  ;;  %v234_v19 = vpack.c.bf16 %v56_v18, %v55_v17  ;;  %v58_v21 = vld [vmem:[#allocation5 + $0x68] sm:$0xff]  ;;  %v59_v23 = vld [vmem:[#allocation5 + $0x70] sm:$0xff]  ;;  %v60_v24 = vld [vmem:[#allocation5 + $0x78] sm:$0xff] }
  0x2c   :  { %v237_v22 = vpack.c.bf16 %v58_v21, %v57_v20  ;;  %v240_v25 = vpack.c.bf16 %v60_v24, %v59_v23  ;;  %v44_v26 = vld [vmem:[#allocation2] sm:$0xf]  ;;  %p301_p5 = por %p300_p4, %p299_p3 }
  0x2d   :  { %v164_v27 = vld [vmem:[%s406_s2] ss:$0 sm:$0xff] }
  0x2e   :  { %223 = vmatpush3.bf16.msra.mxu0 %v222_v7  ;;  %v165_v29 = vld [vmem:[%s407_s3] ss:$0 sm:$0xff]  ;;  %p302_p6 = pnand %p301_p5, %p295_p2 }
  0x2f   :  { %224 = vmatprep.subr.bf16.mxu0 %v326_v0 }
  0x32   :  { %226 = vmatpush3.bf16.msra.mxu0 %v225_v10 }
  0x33   :  { %227 = vmatprep.subr.bf16.mxu0 %v326_v0 }
  0x36   :  { %229 = vmatpush3.bf16.msra.mxu0 %v228_v13 }
  0x37   :  { %230 = vmatprep.subr.bf16.mxu0 %v326_v0 }
  0x3a   :  { %232 = vmatpush3.bf16.msra.mxu0 %v231_v16 }
  0x3b   :  { %233 = vmatprep.subr.bf16.mxu0 %v326_v0 }
  0x3e   :  { %235 = vmatpush3.bf16.msra.mxu0 %v234_v19 }
  0x3f   :  { %236 = vmatprep.subr.bf16.mxu0 %v326_v0 }
  0x42   :  { %238 = vmatpush3.bf16.msra.mxu0 %v237_v22 }
  0x43   :  { %239 = vmatprep.subr.bf16.mxu0 %v326_v0 }
  0x46   :  { %241 = vmatpush3.bf16.msra.mxu0 %v240_v25 }
  0x49   :  { %216 = vmatmul.mubr.f32.vlgmr.msra.gmra.mrb[0].mxu0 %v44_v26 }
 0x11c   :  { %v127_v28 = vpop.f32.mrb[0].mxu0 }
 0x11d   :  { %v138_v30 = vmul.f32 %v164_v27, %v127_v28  ;;  %v217_v31 = vpop.f32.mrb[1].mxu0 }
 0x11f   :  { %v146_v32 = vadd.f32 %v165_v29, %v138_v30 }
 0x121   :  { %147 = vst [vmem:[#allocation7] sm:$0xf] %v146_v32 }
 0x122   :  { %305 = shalt.err (!%p302_p6)
}
 0x123   :  { %s306_s21 = scalar_lea.hbm %s408_s4, 64 }
 0x124   :  { %p307_p7 = scmp.ne.s32.totalorder %s408_s4, %s306_s21  ;;  %p310_p8 = scmp.lt.u32.totalorder %s306_s21, %s408_s4 }
 0x126   :  { %p312_p9 = pnand %p310_p8, %p307_p7 }
 0x128   :  { %315 = shalt.err (!%p312_p9)
}
 0x129   :  { %157 = dma.vmem_to_hbm [thread:$0]  %s155_s18, 64, %s408_s4, [#allocation4]  }
 0x12a   :  { %320 = dma.done.wait [#allocation4], 64  }
 0x12b   :  { %321 = vsyncadd [#allocation4], 4294967232 }
 0x12c   :  { %161 = vsyncpa [#allocation3], 1 }
 0x12d   :  { %162 = vsyncpa [#allocation6], 1 }
 0x12e   :  { %163 = vsyncpa [#allocation4], 1 }

</bundles_post_ra>
